<compile_context>
chip_gen: v6e
topology: v6e:2x2x1
jax: 0.10.0
libtpu: 0.0.40
codegen_flags: <defaults>
</compile_context>

<pallas_src>
import functools

import jax
import jax.numpy as jnp
from jax.experimental import pallas as pl
from jax.experimental.pallas import tpu as pltpu

IN_FEATURES = 52

_VMEM_BUDGET = 20 * 1024 * 1024          # scratch budget for tiles + weights
_VMEM_LIMIT = 40 * 1024 * 1024           # scoped-VMEM limit (<= v7x 64 MiB physical)


def _round_up(x: int, m: int) -> int:
    return ((x + m - 1) // m) * m


def _pick_tile_rows(batch: int, hidden: int) -> int:
    """Rows per grid step: amortize the ~0.35us/step overhead, stay inside VMEM."""
    hidden_p = _round_up(hidden, 128)
    # Resident (constant-index-map) operands; Mosaic may still double-buffer them.
    # (pipeline_mode=pl.Buffered(1) would reclaim half of this; left default for safety.)
    fixed = 2 * 56 * hidden_p * 4            # w1 (52 rows padded to 56 sublanes)
    fixed += 2 * 2 * 8 * hidden_p * 4        # b1 + w2_row (8-sublane padded)
    # Per-row: 2x-buffered x tile (52 lanes padded to 128), 2x-buffered target tile
    # (loss path, padded to 128 lanes), hidden activation + elementwise temps,
    # 2x-buffered lane-dense output.
    per_row = 2 * 512 + 2 * 512 + 12 * hidden_p + 2 * 4
    avail = max(_VMEM_BUDGET - fixed, per_row)
    tb = max(128, (avail // per_row // 128) * 128)   # multiple of 128 (lane-dense out)
    tb = min(tb, 32768)
    if batch > 1024:
        # v7x has 2 TensorCores: guarantee >= 2 grid steps so the "parallel" batch
        # axis actually feeds both cores (harmless on single-core v5e / v6e).
        tb = min(tb, _round_up((batch + 1) // 2, 128))
    if batch <= tb:
        return batch                          # single full-array block (small batch)
    return tb


def _cost_estimate(batch: int, hidden: int, with_targets: bool) -> pl.CostEstimate:
    flops = 2 * batch * IN_FEATURES * hidden + 3 * batch * hidden
    bytes_accessed = batch * IN_FEATURES * 4 + batch * 4
    bytes_accessed += (IN_FEATURES * hidden + 2 * hidden + 1) * 4
    if with_targets:
        bytes_accessed += batch * 4
    return pl.CostEstimate(flops=flops, transcendentals=0,
                           bytes_accessed=bytes_accessed)


def _mlp_forward_kernel(x_ref, w1_ref, b1_ref, w2r_ref, b2_ref, out_ref):
    """out = relu(x @ w1 + b1) . w2 + b2 for one batch tile, stored lane-dense."""
    x = x_ref[...].astype(jnp.float32)
    h = jnp.dot(x, w1_ref[...], preferred_element_type=jnp.float32) + b1_ref[...]
    h = jnp.maximum(h, 0.0)
    # N=1 second matmul on the VPU (mul) + XLU (lane reduce) instead of the MXU.
    y = jnp.sum(h * w2r_ref[...], axis=1, keepdims=True) + b2_ref[...]     # (TB, 1)
    # Sublane->lane relayout (XLU, idle here) -> unmasked lane-dense HBM writeback.
    out_ref[...] = y.reshape(1, -1).astype(out_ref.dtype)                  # (1, TB)


def _mlp_loss_kernel(x_ref, t_ref, w1_ref, b1_ref, w2r_ref, b2_ref, out_ref,
                     *, batch, tile):
    """Per-tile partial sum of squared errors; rows past the real batch are masked."""
    i = pl.program_id(0)
    x = x_ref[...].astype(jnp.float32)
    h = jnp.dot(x, w1_ref[...], preferred_element_type=jnp.float32) + b1_ref[...]
    h = jnp.maximum(h, 0.0)
    y = jnp.sum(h * w2r_ref[...], axis=1, keepdims=True) + b2_ref[...]     # (TB, 1)
    diff = y - t_ref[...].astype(jnp.float32)
    rows = i * tile + jax.lax.broadcasted_iota(jnp.int32, diff.shape, 0)
    sq = jnp.where(rows < batch, diff * diff, 0.0)                         # ragged mask
    out_ref[...] = jnp.full((1, 1, 1), jnp.sum(sq), dtype=out_ref.dtype)


@jax.jit
def mlp_forward(x, w1, b1, w2_row, b2):
    B = x.shape[0]
    H = w1.shape[1]
    tb = _pick_tile_rows(B, H)
    grid = (pl.cdiv(B, tb),)
    out = pl.pallas_call(
        _mlp_forward_kernel,
        out_shape=jax.ShapeDtypeStruct((1, B), jnp.float32),
        grid=grid,
        in_specs=[
            pl.BlockSpec((tb, IN_FEATURES), lambda i: (i, 0)),   # x: streamed over batch
            pl.BlockSpec((IN_FEATURES, H), lambda i: (0, 0)),    # w1: VMEM-resident
            pl.BlockSpec((1, H), lambda i: (0, 0)),              # b1
            pl.BlockSpec((1, H), lambda i: (0, 0)),              # w2 (as a row vector)
            pl.BlockSpec((1, 1), lambda i: (0, 0)),              # b2
        ],
        out_specs=pl.BlockSpec((1, tb), lambda i: (0, i)),       # lane-dense output
        compiler_params=pltpu.CompilerParams(
            dimension_semantics=("parallel",),
            vmem_limit_bytes=_VMEM_LIMIT),
        cost_estimate=_cost_estimate(B, H, with_targets=False),
    )(x, w1, b1, w2_row, b2)
    return out[0]  # (B,) == squeeze(dim=1)


@jax.jit
def mlp_loss(x, targets, w1, b1, w2_row, b2):
    B = x.shape[0]
    H = w1.shape[1]
    tb = _pick_tile_rows(B, H)
    n_tiles = pl.cdiv(B, tb)
    t2d = targets.reshape(-1, 1).astype(jnp.float32)             # glue only
    kernel = functools.partial(_mlp_loss_kernel, batch=B, tile=tb)
    partial_sums = pl.pallas_call(
        kernel,
        out_shape=jax.ShapeDtypeStruct((n_tiles, 1, 1), jnp.float32),
        grid=(n_tiles,),
        in_specs=[
            pl.BlockSpec((tb, IN_FEATURES), lambda i: (i, 0)),   # x tile
            pl.BlockSpec((tb, 1), lambda i: (i, 0)),             # target tile
            pl.BlockSpec((IN_FEATURES, H), lambda i: (0, 0)),    # w1
            pl.BlockSpec((1, H), lambda i: (0, 0)),              # b1
            pl.BlockSpec((1, H), lambda i: (0, 0)),              # w2 row
            pl.BlockSpec((1, 1), lambda i: (0, 0)),              # b2
        ],
        out_specs=pl.BlockSpec((1, 1, 1), lambda i: (i, 0, 0)),  # one partial per tile
        compiler_params=pltpu.CompilerParams(
            dimension_semantics=("parallel",),
            vmem_limit_bytes=_VMEM_LIMIT),
        cost_estimate=_cost_estimate(B, H, with_targets=True),
    )(x, t2d, w1, b1, w2_row, b2)
    return jnp.sum(partial_sums)                                  # tiny reduction in JAX


def _reference_forward(x, w1, b1, w2, b2):
    h = jnp.maximum(x @ w1 + b1, 0.0)
    return (h @ w2 + b2)[:, 0]


class SimpleModelPallas:
    """Pallas port of SimpleModel(size)."""

    def __init__(self, size: int, key=None):
        if key is None:
            key = jax.random.PRNGKey(0)
        k1, k2, k3, k4 = jax.random.split(key, 4)
        # Deterministic init mimicking torch.nn.Linear's U(-1/sqrt(fan_in), 1/sqrt(fan_in)).
        bound1 = 1.0 / jnp.sqrt(jnp.float32(IN_FEATURES))
        bound2 = 1.0 / jnp.sqrt(jnp.float32(size))
        self.w1 = jax.random.uniform(k1, (IN_FEATURES, size), jnp.float32, -bound1, bound1)
        self.b1 = jax.random.uniform(k2, (1, size), jnp.float32, -bound1, bound1)
        self.w2 = jax.random.uniform(k3, (size, 1), jnp.float32, -bound2, bound2)
        self.b2 = jax.random.uniform(k4, (1, 1), jnp.float32, -bound2, bound2)
        self._w2_row = self.w2.reshape(1, size)   # (1, H) layout used by the kernels

    def __call__(self, inputs, targets=None):
        if targets is None:
            return mlp_forward(inputs, self.w1, self.b1, self._w2_row, self.b2)
        return mlp_loss(inputs, targets, self.w1, self.b1, self._w2_row, self.b2)


if __name__ == "__main__":
    batch, size = 8, 32
    key = jax.random.PRNGKey(0)
    kx, kt, kp, kx2, kt2 = jax.random.split(key, 5)

    x = jax.random.normal(kx, (batch, IN_FEATURES), dtype=jnp.float32)
    targets = jax.random.normal(kt, (batch,), dtype=jnp.float32)

    model = SimpleModelPallas(size, key=kp)

    # Path 1: targets is None -> per-example outputs, shape (batch,)
    outputs = jax.block_until_ready(model(x, None))
    assert outputs.shape == (batch,)

    # Path 2: targets given -> scalar sum-of-squared-errors loss
    loss = jax.block_until_ready(model(x, targets))
    assert loss.shape == ()

    out_ref = _reference_forward(x, model.w1, model.b1, model.w2, model.b2)
    loss_ref = jnp.sum((out_ref - targets) ** 2)
    assert jnp.allclose(outputs, out_ref, atol=1e-3, rtol=1e-3), "forward mismatch (small batch)"
    assert jnp.allclose(loss, loss_ref, atol=1e-2, rtol=1e-3), "loss mismatch (small batch)"

    # Multi-tile gridded path: ragged last tile + masking + >=2 grid steps (megacore).
    big = 3000
    xb = jax.random.normal(kx2, (big, IN_FEATURES), dtype=jnp.float32)
    tbg = jax.random.normal(kt2, (big,), dtype=jnp.float32)
    out_b = jax.block_until_ready(model(xb, None))
    loss_b = jax.block_until_ready(model(xb, tbg))
    assert out_b.shape == (big,)
    out_b_ref = _reference_forward(xb, model.w1, model.b1, model.w2, model.b2)
    loss_b_ref = jnp.sum((out_b_ref - tbg) ** 2)
    assert jnp.allclose(out_b, out_b_ref, atol=1e-3, rtol=1e-3), "forward mismatch (gridded)"
    assert jnp.allclose(loss_b, loss_b_ref, atol=1e-1, rtol=1e-3), "loss mismatch (gridded)"

    print("KERNEL_OK")
</pallas_src>

<mosaic_0001>
module attributes {stable_mosaic.version = 11 : i64} {
  func.func @_mlp_forward_kernel(%arg0: i32, %arg1: memref<8x52xf32, #tpu.memory_space<vmem>>, %arg2: memref<52x32xf32, #tpu.memory_space<vmem>>, %arg3: memref<1x32xf32, #tpu.memory_space<vmem>>, %arg4: memref<1x32xf32, #tpu.memory_space<vmem>>, %arg5: memref<1x1xf32, #tpu.memory_space<vmem>>, %arg6: memref<1x8xf32, #tpu.memory_space<vmem>>) attributes {dimension_semantics = [#tpu.dimension_semantics<parallel>], iteration_bounds = array<i64: 1>, scalar_prefetch = 0 : i64, scratch_operands = 0 : i64, tpu.core_type = #tpu.core_type<tc>, window_params = [{transform_indices = @transform_0, window_bounds = array<i64: 8, 52>}, {pipeline_mode = #tpu.pipeline_mode<synchronous>, transform_indices = @transform_1, window_bounds = array<i64: 52, 32>}, {pipeline_mode = #tpu.pipeline_mode<synchronous>, transform_indices = @transform_2, window_bounds = array<i64: 1, 32>}, {pipeline_mode = #tpu.pipeline_mode<synchronous>, transform_indices = @transform_3, window_bounds = array<i64: 1, 32>}, {pipeline_mode = #tpu.pipeline_mode<synchronous>, transform_indices = @transform_4, window_bounds = array<i64: 1, 1>}, {transform_indices = @transform_5, window_bounds = array<i64: 1, 8>}]} {
    %c0 = arith.constant 0 : index
    %c0_0 = arith.constant 0 : index
    %0 = vector.load %arg1[%c0, %c0_0] : memref<8x52xf32, #tpu.memory_space<vmem>>, vector<8x52xf32>
    %c0_1 = arith.constant 0 : index
    %c0_2 = arith.constant 0 : index
    %1 = vector.load %arg2[%c0_1, %c0_2] : memref<52x32xf32, #tpu.memory_space<vmem>>, vector<52x32xf32>
    %cst = arith.constant dense<0.000000e+00> : vector<8x32xf32>
    %2 = tpu.matmul %0, %1, %cst {dimension_numbers = #tpu.dot_dimension_numbers<[1], [0], [0], [1], [0, 0, 1, 1], [], []>} : vector<8x52xf32>, vector<52x32xf32>, vector<8x32xf32> -> vector<8x32xf32>
    %c0_3 = arith.constant 0 : index
    %c0_4 = arith.constant 0 : index
    %3 = vector.load %arg3[%c0_3, %c0_4] : memref<1x32xf32, #tpu.memory_space<vmem>>, vector<1x32xf32>
    %4 = vector.broadcast %3 : vector<1x32xf32> to vector<8x32xf32>
    %5 = arith.addf %2, %4 : vector<8x32xf32>
    %cst_5 = arith.constant 0.000000e+00 : f32
    %6 = vector.broadcast %cst_5 : f32 to vector<8x32xf32>
    %7 = arith.maximumf %5, %6 : vector<8x32xf32>
    %c0_6 = arith.constant 0 : index
    %c0_7 = arith.constant 0 : index
    %8 = vector.load %arg4[%c0_6, %c0_7] : memref<1x32xf32, #tpu.memory_space<vmem>>, vector<1x32xf32>
    %9 = vector.broadcast %8 : vector<1x32xf32> to vector<8x32xf32>
    %10 = arith.mulf %7, %9 : vector<8x32xf32>
    %cst_8 = arith.constant dense<0.000000e+00> : vector<8xf32>
    %11 = vector.multi_reduction <add>, %10, %cst_8 [1] : vector<8x32xf32> to vector<8xf32>
    %12 = vector.shape_cast %11 : vector<8xf32> to vector<8x1xf32>
    %c0_9 = arith.constant 0 : index
    %c0_10 = arith.constant 0 : index
    %13 = vector.load %arg5[%c0_9, %c0_10] : memref<1x1xf32, #tpu.memory_space<vmem>>, vector<1x1xf32>
    %14 = vector.broadcast %13 : vector<1x1xf32> to vector<8x1xf32>
    %15 = arith.addf %12, %14 : vector<8x1xf32>
    %16 = vector.shape_cast %15 : vector<8x1xf32> to vector<1x8xf32>
    %c0_11 = arith.constant 0 : index
    %c0_12 = arith.constant 0 : index
    %17 = vector.load %arg6[%c0_11, %c0_12] : memref<1x8xf32, #tpu.memory_space<vmem>>, vector<1x8xf32>
    tpu.vector_store %arg6[%c0_11, %c0_12], %16 {strides = array<i32>} : memref<1x8xf32, #tpu.memory_space<vmem>>, vector<1x8xf32>,
    return
  }
  func.func @transform_0(%arg0: i32) -> (i32, i32) {
    %c0_i32 = arith.constant 0 : i32
    %c0_i32_0 = arith.constant 0 : i32
    return %arg0, %c0_i32 : i32, i32
  }
  func.func @transform_1(%arg0: i32) -> (i32, i32) {
    %c0_i32 = arith.constant 0 : i32
    %c0_i32_0 = arith.constant 0 : i32
    %c0_i32_1 = arith.constant 0 : i32
    return %c0_i32, %c0_i32_0 : i32, i32
  }
  func.func @transform_2(%arg0: i32) -> (i32, i32) {
    %c0_i32 = arith.constant 0 : i32
    %c0_i32_0 = arith.constant 0 : i32
    %c0_i32_1 = arith.constant 0 : i32
    return %c0_i32, %c0_i32_0 : i32, i32
  }
  func.func @transform_3(%arg0: i32) -> (i32, i32) {
    %c0_i32 = arith.constant 0 : i32
    %c0_i32_0 = arith.constant 0 : i32
    %c0_i32_1 = arith.constant 0 : i32
    return %c0_i32, %c0_i32_0 : i32, i32
  }
  func.func @transform_4(%arg0: i32) -> (i32, i32) {
    %c0_i32 = arith.constant 0 : i32
    %c0_i32_0 = arith.constant 0 : i32
    %c0_i32_1 = arith.constant 0 : i32
    return %c0_i32, %c0_i32_0 : i32, i32
  }
  func.func @transform_5(%arg0: i32) -> (i32, i32) {
    %c0_i32 = arith.constant 0 : i32
    %c0_i32_0 = arith.constant 0 : i32
    return %c0_i32, %arg0 : i32, i32
  }
}

</mosaic_0001>

<bundles_post_ra>
// kernel: mlp_forward.1
= control target key start
LH: loop header
LB: loop body
LE: loop exit
PB: predicated region body
PF: predicated region fallthrough
CT: control target
= control target key end

     0   :  { %s291_s0 = inlined_call_operand.vmem [shape: f32[8,52], index: 0, kind: input, shape index: {}]   ;;  %s292_s1 = inlined_call_operand.vmem [shape: f32[52,32], index: 1, kind: input, shape index: {}]   ;;  %s293_s2 = inlined_call_operand.vmem [shape: f32[1,32], index: 2, kind: input, shape index: {}]   ;;  %s294_s3 = inlined_call_operand.vmem [shape: f32[1,32], index: 3, kind: input, shape index: {}]   ;;  %s295_s4 = inlined_call_operand.<no memory space> [shape: f32[1,1], index: 4, kind: input, shape index: {}]   ;;  %s296_s5 = inlined_call_operand.hbm [shape: f32[1,8], index: 5, kind: output, shape index: {}]  }
   0x1   :  { %v10_v0 = vstv %s295_s4 }
   0x2   :  { %11 = vst [vmem:[#allocation2] sm:$0x1] %v10_v0 }
   0x3   :  { %v30_v1 = vld [vmem:[%s292_s1 + $0x30] sm:$0xf]  ;;  %vm42_vm0 = vcmask 1043456   ;;  %v221_v2 = vmov 0.0   ;;  %v29_v3 = vld [vmem:[%s292_s1 + $0x28] sm:$0xff]  ;;  %vm222_vm1 = vmmov 0  }
   0x4   :  { %177 = vmatprep.subr.mxu0 %v221_v2  ;;  %191 = vmatprep.mubr.msk.f32.mxu0 %vm222_vm1, %v221_v2  ;;  %v28_v4 = vld [vmem:[%s292_s1 + $0x20] sm:$0xff] }
   0x5   :  { %178 = vmatpush3.msk.msra.mxu0 %vm42_vm0, %v30_v1 }
   0x6   :  { %179 = vmatprep.subr.mxu0 %v221_v2 }
   0x7   :  { %12 = vsyncpa [#allocation4], 0  ;;  %180 = vmatpush3.msra.mxu0 %v29_v3  ;;  %v27_v5 = vld [vmem:[%s292_s1 + $0x18] sm:$0xff]  ;;  %v26_v6 = vld [vmem:[%s292_s1 + $0x10] sm:$0xff]  ;;  %vm38_vm2 = vcmask 424960   ;;  %vm125_vm3 = vcmask 261120   ;;  %v141_v22 = vlaneseq }
   0x8   :  { %181 = vmatprep.subr.mxu0 %v221_v2  ;;  %v25_v7 = vld [vmem:[%s292_s1 + $0x8] sm:$0xff]  ;;  %v24_v8 = vld [vmem:[%s292_s1] sm:$0xff]  ;;  %v223_v18 = vmov 0   ;;  %vm148_vm4 = vcmask 57344  }
   0x9   :  { %182 = vmatpush3.msra.mxu0 %v28_v4  ;;  %v23_v9 = vld [vmem:[%s291_s0] sm:$0xff]  ;;  %198 = vset.pattern.permute.xlu0 %v223_v18  ;;  %v142_v23 = vand.u32 127, %v141_v22  ;;  %v144_v24 = vshrl.u32 %v141_v22, 7  ;;  %s224_s0 = smov [#allocation3]  }
   0xa   :  { %183 = vmatprep.subr.mxu0 %v221_v2  ;;  %v164_v10 = vld [vmem:[%s293_s2] ss:$0 sm:$0xff]  ;;  %s156_s1 = sshll.u32 %s224_s0, 4  ;;  %s157_s1 = int_to_ptr.vmem [resolvable:$true] %s156_s1 }
   0xb   :  { %184 = vmatpush3.msra.mxu0 %v27_v5  ;;  %v167_v14 = vld [vmem:[%s294_s3] ss:$0 sm:$0xff]  ;;  %v145_v25 = vsub.s32 %v142_v23, %v144_v24  ;;  %s199_s2 = scalar_lea.vmem %s157_s1, 16  ;;  %s203_s3 = scalar_lea.vmem %s157_s1, 32 }
   0xc   :  { %185 = vmatprep.subr.mxu0 %v221_v2  ;;  %v168_v19 = vld [vmem:[#allocation2] ss:$0 sm:$0xff]  ;;  %p200_p0 = scmp.ne.s32.totalorder %s157_s1, %s199_s2  ;;  %p204_p1 = scmp.lt.s32.totalorder %s157_s1, %s157_s1 }
   0xd   :  { %186 = vmatpush3.msra.mxu0 %v26_v6  ;;  %p205_p2 = scmp.lt.s32.totalorder %s203_s3, %s199_s2 }
   0xe   :  { %187 = vmatprep.subr.mxu0 %v221_v2 }
   0xf   :  { %188 = vmatpush3.msra.mxu0 %v25_v7  ;;  %p206_p3 = por %p205_p2, %p204_p1 }
  0x10   :  { %189 = vmatprep.subr.mxu0 %v221_v2 }
  0x11   :  { %190 = vmatpush3.msra.mxu0 %v24_v8  ;;  %p207_p4 = pnand %p206_p3, %p200_p0 }
  0x12   :  { %192 = vmatmul.mubr.msk.f32.vlgmr.msra.gmra.mxu0 %vm38_vm2, %v23_v9 }
  0xd2   :  { %v112_v11 = vpop.f32.mrf.mxu0 }
  0xd3   :  { %v113_v12 = vadd.f32 %v164_v10, %v112_v11 }
  0xd4   :  { %v193_v13 = vpop.f32.mrf.mxu0 }
  0xd5   :  { %v116_v15 = vmax.f32 %v113_v12, 0.0 }
  0xd7   :  { %v124_v16 = vmul.f32 %v167_v14, %v116_v15 }
  0xd9   :  { %v126_v17 = vsel %vm125_vm3, %v124_v16, 0.0 }
  0xda   :  { %127 = vadd.xlane.f32.xlu0 %v126_v17 }
 0x163   :  { %v128_v20 = vpop.xlane.xlu0 %127 }
 0x164   :  { %v136_v21 = vadd.f32 %v168_v19, %v128_v20 }
 0x166   :  { %139 = vperm.xlu0 %198, %v136_v21  }
 0x1e1   :  { %v140_v26 = vpop.permute.xlu0 %139 }
 0x1e2   :  { %v146_v27 = vrot.slane %v140_v26, %v145_v25 }
 0x1e4   :  { %149 = vst.msk [vmem:[#allocation3] sm:$0x1] %vm148_vm4, %v146_v27 }
 0x1e5   :  { %210 = shalt.err (!%p207_p4)
}
 0x1e6   :  { %159 = dma.vmem_to_hbm [thread:$0]  %s157_s1, 16, %s296_s5, [#allocation4]  }
 0x1e7   :  { %219 = dma.done.wait [#allocation4], 16  }
 0x1e8   :  { %220 = vsyncadd [#allocation4], 4294967280 }
 0x1e9   :  { %163 = vsyncpa [#allocation4], 1 }

</bundles_post_ra>
